<compile_context>
chip_gen: v7x
topology: tpu7x:2x2x1
jax: 0.10.0
libtpu: 0.0.40
codegen_flags: <defaults>
</compile_context>

<pallas_src>
import jax
import jax.numpy as jnp
from jax.experimental import pallas as pl
from jax.experimental.pallas import tpu as pltpu


def tiny_mlp_kernel(x_ref, w1_ref, b1_ref, w2_ref, b2_ref, w3_ref, b3_ref, o_ref):
    # Cast x to the matmul dtype inside the kernel (input stays f32 in HBM).
    x = x_ref[...].astype(w1_ref.dtype)
    # Layer 1: bf16 MXU inputs, f32 accumulation, f32 bias add, ReLU.
    h = jnp.dot(x, w1_ref[...], preferred_element_type=jnp.float32) + b1_ref[...]
    h = jnp.maximum(h, 0.0).astype(w2_ref.dtype)
    # Layer 2
    h = jnp.dot(h, w2_ref[...], preferred_element_type=jnp.float32) + b2_ref[...]
    h = jnp.maximum(h, 0.0).astype(w3_ref.dtype)
    # Layer 3 (natural out_dim width; stores are masked vst but the vst slot is idle)
    y = jnp.dot(h, w3_ref[...], preferred_element_type=jnp.float32) + b3_ref[...]
    o_ref[...] = y.astype(o_ref.dtype)


def prepare_params(params, compute_dtype=jnp.bfloat16):
    """One-time parameter preprocessing (hoisted out of the per-call path)."""
    return dict(
        w1=params["w1"].astype(compute_dtype),
        b1=params["b1"].reshape(1, -1).astype(jnp.float32),
        w2=params["w2"].astype(compute_dtype),
        b2=params["b2"].reshape(1, -1).astype(jnp.float32),
        w3=params["w3"].astype(compute_dtype),
        b3=params["b3"].reshape(1, -1).astype(jnp.float32),
    )


def _pick_row_tile(B, *, max_tm=2048, single_block_max=1024, min_steps=2):
    """Row-tile selection: single block for small batches; for large batches cap
    the tile at max_tm rows but keep >= min_steps grid steps (v7x megacore)."""
    if B <= single_block_max:
        return B, 1                       # tile == full batch dim (always legal)
    tm = min(max_tm, pl.cdiv(B, min_steps))
    tm = max(8, (tm // 8) * 8)            # sublane-align the row tile
    return tm, pl.cdiv(B, tm)


def tiny_mlp_forward(x, prepared):
    """x: (B, ...) any trailing dims (flattened); prepared: output of prepare_params."""
    B = x.shape[0]
    x2d = x.reshape(B, -1)                # == torch x.flatten(start_dim=1)
    in_dim = x2d.shape[1]

    w1, b1 = prepared["w1"], prepared["b1"]
    w2, b2 = prepared["w2"], prepared["b2"]
    w3, b3 = prepared["w3"], prepared["b3"]
    hid = w1.shape[1]
    out_dim = w3.shape[1]

    tm, n_tiles = _pick_row_tile(B)

    flops = 2 * B * (in_dim * hid + hid * hid + hid * out_dim)
    bytes_accessed = (
        x2d.size * x2d.dtype.itemsize
        + sum(a.size * a.dtype.itemsize for a in (w1, b1, w2, b2, w3, b3))
        + B * out_dim * 4
    )

    def resident(a):
        # Weights / biases: same block every grid step -> stay VMEM-resident.
        return pl.BlockSpec(a.shape, lambda i: (0,) * a.ndim)

    out = pl.pallas_call(
        tiny_mlp_kernel,
        out_shape=jax.ShapeDtypeStruct((B, out_dim), jnp.float32),
        grid=(n_tiles,),
        in_specs=[
            pl.BlockSpec((tm, in_dim), lambda i: (i, 0)),   # stream x rows
            resident(w1), resident(b1),
            resident(w2), resident(b2),
            resident(w3), resident(b3),
        ],
        out_specs=pl.BlockSpec((tm, out_dim), lambda i: (i, 0)),
        compiler_params=pltpu.CompilerParams(
            dimension_semantics=("parallel",),              # v7x: both TCs share batch
        ),
        cost_estimate=pl.CostEstimate(
            flops=flops, transcendentals=0, bytes_accessed=bytes_accessed
        ),
    )(x2d, w1, b1, w2, b2, w3, b3)

    return out


def init_params(key, in_dim, hid, out_dim):
    """Deterministic init mirroring nn.Linear's default (uniform +-1/sqrt(fan_in))."""
    ks = jax.random.split(key, 6)

    def linear(kw, kb, fan_in, fan_out):
        bound = 1.0 / jnp.sqrt(fan_in)
        w = jax.random.uniform(kw, (fan_in, fan_out), jnp.float32, -bound, bound)
        b = jax.random.uniform(kb, (fan_out,), jnp.float32, -bound, bound)
        return w, b

    w1, b1 = linear(ks[0], ks[1], in_dim, hid)
    w2, b2 = linear(ks[2], ks[3], hid, hid)
    w3, b3 = linear(ks[4], ks[5], hid, out_dim)
    return dict(w1=w1, b1=b1, w2=w2, b2=b2, w3=w3, b3=b3)


def reference_forward(x, params, compute_dtype=jnp.bfloat16):
    """Pure-JAX reference mimicking the kernel's precision pipeline
    (bf16 matmul inputs, f32 accumulation and bias add)."""
    cast = lambda a: a.astype(compute_dtype).astype(jnp.float32)
    h = cast(x.reshape(x.shape[0], -1))
    h = jnp.maximum(h @ cast(params["w1"]) + params["b1"], 0.0)
    h = jnp.maximum(cast(h) @ cast(params["w2"]) + params["b2"], 0.0)
    return cast(h) @ cast(params["w3"]) + params["b3"]


if __name__ == "__main__":
    # Shapes consistent with the module: input (B, C, H, W) flattened to C*H*W = 64.
    B, C, H, W = 256, 4, 4, 4
    in_dim = C * H * W  # 64
    hid = 32
    out_dim = 8

    key = jax.random.PRNGKey(0)
    kx, kp = jax.random.split(key)
    x = jax.random.normal(kx, (B, C, H, W), dtype=jnp.float32)
    params = init_params(kp, in_dim, hid, out_dim)
    prepared = prepare_params(params)

    # Main run: small batch -> single grid step, tile == batch.
    out = jax.block_until_ready(tiny_mlp_forward(x, prepared))
    ref = reference_forward(x, params)
    assert out.shape == (B, out_dim), out.shape
    assert jnp.allclose(out, ref, atol=5e-3, rtol=5e-3), "mismatch vs JAX reference"

    # Tiny-batch path (single 2-row tile, no padding anywhere).
    out_small = jax.block_until_ready(tiny_mlp_forward(x[:2], prepared))
    ref_small = reference_forward(x[:2], params)
    assert out_small.shape == (2, out_dim), out_small.shape
    assert jnp.allclose(out_small, ref_small, atol=5e-3, rtol=5e-3), "small-batch mismatch"

    # Multi-step grid with a ragged last tile (exercises partial-block masking).
    Bl = 1201
    xl = jax.random.normal(jax.random.PRNGKey(1), (Bl, C, H, W), dtype=jnp.float32)
    out_l = jax.block_until_ready(tiny_mlp_forward(xl, prepared))
    ref_l = reference_forward(xl, params)
    assert out_l.shape == (Bl, out_dim), out_l.shape
    assert jnp.allclose(out_l, ref_l, atol=5e-3, rtol=5e-3), "ragged-batch mismatch"

    print("KERNEL_OK")
</pallas_src>

<mosaic_0001>
module attributes {stable_mosaic.version = 11 : i64} {
  func.func @tiny_mlp_kernel(%arg0: i32, %arg1: memref<256x64xf32, #tpu.memory_space<vmem>>, %arg2: memref<64x32xbf16, #tpu.memory_space<vmem>>, %arg3: memref<1x32xf32, #tpu.memory_space<vmem>>, %arg4: memref<32x32xbf16, #tpu.memory_space<vmem>>, %arg5: memref<1x32xf32, #tpu.memory_space<vmem>>, %arg6: memref<32x8xbf16, #tpu.memory_space<vmem>>, %arg7: memref<1x8xf32, #tpu.memory_space<vmem>>, %arg8: memref<256x8xf32, #tpu.memory_space<vmem>>) attributes {dimension_semantics = [#tpu.dimension_semantics<parallel>], iteration_bounds = array<i64: 1>, scalar_prefetch = 0 : i64, scratch_operands = 0 : i64, tpu.core_type = #tpu.core_type<tc>, window_params = [{transform_indices = @transform_0, window_bounds = array<i64: 256, 64>}, {pipeline_mode = #tpu.pipeline_mode<synchronous>, transform_indices = @transform_1, window_bounds = array<i64: 64, 32>}, {pipeline_mode = #tpu.pipeline_mode<synchronous>, transform_indices = @transform_2, window_bounds = array<i64: 1, 32>}, {pipeline_mode = #tpu.pipeline_mode<synchronous>, transform_indices = @transform_3, window_bounds = array<i64: 32, 32>}, {pipeline_mode = #tpu.pipeline_mode<synchronous>, transform_indices = @transform_4, window_bounds = array<i64: 1, 32>}, {pipeline_mode = #tpu.pipeline_mode<synchronous>, transform_indices = @transform_5, window_bounds = array<i64: 32, 8>}, {pipeline_mode = #tpu.pipeline_mode<synchronous>, transform_indices = @transform_6, window_bounds = array<i64: 1, 8>}, {transform_indices = @transform_7, window_bounds = array<i64: 256, 8>}]} {
    %c0 = arith.constant 0 : index
    %c0_0 = arith.constant 0 : index
    %0 = vector.load %arg1[%c0, %c0_0] : memref<256x64xf32, #tpu.memory_space<vmem>>, vector<256x64xf32>
    %1 = arith.truncf %0 : vector<256x64xf32> to vector<256x64xbf16>
    %c0_1 = arith.constant 0 : index
    %c0_2 = arith.constant 0 : index
    %2 = vector.load %arg2[%c0_1, %c0_2] : memref<64x32xbf16, #tpu.memory_space<vmem>>, vector<64x32xbf16>
    %cst = arith.constant dense<0.000000e+00> : vector<256x32xf32>
    %3 = tpu.matmul %1, %2, %cst {dimension_numbers = #tpu.dot_dimension_numbers<[1], [0], [0], [1], [0, 0, 1, 1], [], []>} : vector<256x64xbf16>, vector<64x32xbf16>, vector<256x32xf32> -> vector<256x32xf32>
    %c0_3 = arith.constant 0 : index
    %c0_4 = arith.constant 0 : index
    %4 = vector.load %arg3[%c0_3, %c0_4] : memref<1x32xf32, #tpu.memory_space<vmem>>, vector<1x32xf32>
    %5 = vector.broadcast %4 : vector<1x32xf32> to vector<256x32xf32>
    %6 = arith.addf %3, %5 : vector<256x32xf32>
    %cst_5 = arith.constant 0.000000e+00 : f32
    %7 = vector.broadcast %cst_5 : f32 to vector<256x32xf32>
    %8 = arith.maximumf %6, %7 : vector<256x32xf32>
    %9 = arith.truncf %8 : vector<256x32xf32> to vector<256x32xbf16>
    %c0_6 = arith.constant 0 : index
    %c0_7 = arith.constant 0 : index
    %10 = vector.load %arg4[%c0_6, %c0_7] : memref<32x32xbf16, #tpu.memory_space<vmem>>, vector<32x32xbf16>
    %cst_8 = arith.constant dense<0.000000e+00> : vector<256x32xf32>
    %11 = tpu.matmul %9, %10, %cst_8 {dimension_numbers = #tpu.dot_dimension_numbers<[1], [0], [0], [1], [0, 0, 1, 1], [], []>} : vector<256x32xbf16>, vector<32x32xbf16>, vector<256x32xf32> -> vector<256x32xf32>
    %c0_9 = arith.constant 0 : index
    %c0_10 = arith.constant 0 : index
    %12 = vector.load %arg5[%c0_9, %c0_10] : memref<1x32xf32, #tpu.memory_space<vmem>>, vector<1x32xf32>
    %13 = vector.broadcast %12 : vector<1x32xf32> to vector<256x32xf32>
    %14 = arith.addf %11, %13 : vector<256x32xf32>
    %cst_11 = arith.constant 0.000000e+00 : f32
    %15 = vector.broadcast %cst_11 : f32 to vector<256x32xf32>
    %16 = arith.maximumf %14, %15 : vector<256x32xf32>
    %17 = arith.truncf %16 : vector<256x32xf32> to vector<256x32xbf16>
    %c0_12 = arith.constant 0 : index
    %c0_13 = arith.constant 0 : index
    %18 = vector.load %arg6[%c0_12, %c0_13] : memref<32x8xbf16, #tpu.memory_space<vmem>>, vector<32x8xbf16>
    %cst_14 = arith.constant dense<0.000000e+00> : vector<256x8xf32>
    %19 = tpu.matmul %17, %18, %cst_14 {dimension_numbers = #tpu.dot_dimension_numbers<[1], [0], [0], [1], [0, 0, 1, 1], [], []>} : vector<256x32xbf16>, vector<32x8xbf16>, vector<256x8xf32> -> vector<256x8xf32>
    %c0_15 = arith.constant 0 : index
    %c0_16 = arith.constant 0 : index
    %20 = vector.load %arg7[%c0_15, %c0_16] : memref<1x8xf32, #tpu.memory_space<vmem>>, vector<1x8xf32>
    %21 = vector.broadcast %20 : vector<1x8xf32> to vector<256x8xf32>
    %22 = arith.addf %19, %21 : vector<256x8xf32>
    %c0_17 = arith.constant 0 : index
    %c0_18 = arith.constant 0 : index
    %23 = vector.load %arg8[%c0_17, %c0_18] : memref<256x8xf32, #tpu.memory_space<vmem>>, vector<256x8xf32>
    tpu.vector_store %arg8[%c0_17, %c0_18], %22 {strides = array<i32>} : memref<256x8xf32, #tpu.memory_space<vmem>>, vector<256x8xf32>,
    return
  }
  func.func @transform_0(%arg0: i32) -> (i32, i32) {
    %c0_i32 = arith.constant 0 : i32
    %c0_i32_0 = arith.constant 0 : i32
    return %arg0, %c0_i32 : i32, i32
  }
  func.func @transform_1(%arg0: i32) -> (i32, i32) {
    %c0_i32 = arith.constant 0 : i32
    %c0_i32_0 = arith.constant 0 : i32
    %c0_i32_1 = arith.constant 0 : i32
    return %c0_i32, %c0_i32_0 : i32, i32
  }
  func.func @transform_2(%arg0: i32) -> (i32, i32) {
    %c0_i32 = arith.constant 0 : i32
    %c0_i32_0 = arith.constant 0 : i32
    %c0_i32_1 = arith.constant 0 : i32
    return %c0_i32, %c0_i32_0 : i32, i32
  }
  func.func @transform_3(%arg0: i32) -> (i32, i32) {
    %c0_i32 = arith.constant 0 : i32
    %c0_i32_0 = arith.constant 0 : i32
    %c0_i32_1 = arith.constant 0 : i32
    return %c0_i32, %c0_i32_0 : i32, i32
  }
  func.func @transform_4(%arg0: i32) -> (i32, i32) {
    %c0_i32 = arith.constant 0 : i32
    %c0_i32_0 = arith.constant 0 : i32
    %c0_i32_1 = arith.constant 0 : i32
    return %c0_i32, %c0_i32_0 : i32, i32
  }
  func.func @transform_5(%arg0: i32) -> (i32, i32) {
    %c0_i32 = arith.constant 0 : i32
    %c0_i32_0 = arith.constant 0 : i32
    %c0_i32_1 = arith.constant 0 : i32
    return %c0_i32, %c0_i32_0 : i32, i32
  }
  func.func @transform_6(%arg0: i32) -> (i32, i32) {
    %c0_i32 = arith.constant 0 : i32
    %c0_i32_0 = arith.constant 0 : i32
    %c0_i32_1 = arith.constant 0 : i32
    return %c0_i32, %c0_i32_0 : i32, i32
  }
  func.func @transform_7(%arg0: i32) -> (i32, i32) {
    %c0_i32 = arith.constant 0 : i32
    %c0_i32_0 = arith.constant 0 : i32
    return %arg0, %c0_i32 : i32, i32
  }
}

</mosaic_0001>

<bundles_post_ra>
// kernel: tpu_custom_call.1
= control target key start
LH: loop header
LB: loop body
LE: loop exit
PB: predicated region body
PF: predicated region fallthrough
CT: control target
= control target key end

     0   :  { %vm114_vm0 = vcmask 523264   ;;  %vm395_vm1 = vcmask 261120   ;;  %vm885_vm2 = vcmask 64512   ;;  %s1612_s1 = inlined_call_operand.vmem [shape: bf16[64,32], index: 1, kind: input, shape index: {}]   ;;  %s1613_s0 = inlined_call_operand.vmem [shape: f32[256,64], index: 0, kind: input, shape index: {}]   ;;  %s1614_s3 = inlined_call_operand.vmem [shape: bf16[32,32], index: 3, kind: input, shape index: {}]   ;;  %s1615_s5 = inlined_call_operand.vmem [shape: bf16[32,8], index: 5, kind: input, shape index: {}]   ;;  %s1616_s2 = inlined_call_operand.vmem [shape: f32[1,32], index: 2, kind: input, shape index: {}]   ;;  %s1617_s4 = inlined_call_operand.vmem [shape: f32[1,32], index: 4, kind: input, shape index: {}]   ;;  %s1618_s6 = inlined_call_operand.vmem [shape: f32[1,8], index: 6, kind: input, shape index: {}]   ;;  %s1619_s7 = inlined_call_operand.vmem [shape: f32[256,8], index: 7, kind: output, shape index: {}]  }
   0x1   :  { %v1153_v0 = vld [vmem:[%s1612_s1] sm:$0xff]   ;;  %v1154_v1 = vld [vmem:[%s1612_s1 + $0x8] sm:$0xff]   ;;  %v1155_v2 = vld [vmem:[%s1612_s1 + $0x10] sm:$0xff]  }
   0x2   :  { %1037 = vmatprep.subr.bf16.mxu0 %v1153_v0  ;;  %v27_v3 = vld [vmem:[%s1613_s0] sm:$0xff]  ;;  %v28_v4 = vld [vmem:[%s1613_s0 + $0x8] sm:$0xff]  ;;  %v1156_v6 = vld [vmem:[%s1612_s1 + $0x18] sm:$0xff]  }
   0x3   :  { %1038 = vmatpush3.bf16.msra.mxu0 %v1153_v0  ;;  %v59_v5 = vpack.c.bf16 %v28_v4, %v27_v3  ;;  %v29_v7 = vld [vmem:[%s1613_s0 + $0x10] sm:$0xff]  ;;  %v30_v8 = vld [vmem:[%s1613_s0 + $0x18] sm:$0xff]  ;;  %v31_v9 = vld [vmem:[%s1613_s0 + $0x20] sm:$0xff] }
   0x4   :  { %1039 = vmatprep.subr.bf16.mxu0 %v1154_v1  ;;  %v32_v10 = vld [vmem:[%s1613_s0 + $0x28] sm:$0xff]  ;;  %v60_v11 = vpack.c.bf16 %v30_v8, %v29_v7  ;;  %v1157_v13 = vld [vmem:[%s1614_s3] sm:$0xff]   ;;  %v33_v15 = vld [vmem:[%s1613_s0 + $0x30] sm:$0xff] }
   0x5   :  { %1045 = vmatprep.mubr.msk.bf16.mxu0 %vm114_vm0, %v59_v5  ;;  %v61_v12 = vpack.c.bf16 %v32_v10, %v31_v9  ;;  %v1158_v14 = vld [vmem:[%s1614_s3 + $0x8] sm:$0xff]   ;;  %1149 = vmatprep.subr.bf16.mxu1 %v1157_v13  ;;  %v34_v16 = vld [vmem:[%s1613_s0 + $0x38] sm:$0xff]  ;;  %v35_v17 = vld [vmem:[%s1613_s0 + $0x40] sm:$0xff] }
   0x6   :  { %1151 = vmatpush3.bf16.msra.mxu1 %v1157_v13  ;;  %v36_v18 = vld [vmem:[%s1613_s0 + $0x48] sm:$0xff]  ;;  %v62_v19 = vpack.c.bf16 %v34_v16, %v33_v15  ;;  %v37_v21 = vld [vmem:[%s1613_s0 + $0x50] sm:$0xff]  ;;  %v38_v22 = vld [vmem:[%s1613_s0 + $0x58] sm:$0xff] }
   0x7   :  { %1040 = vmatpush3.bf16.msra.mxu0 %v1154_v1  ;;  %1150 = vmatprep.subr.bf16.mxu1 %v1158_v14  ;;  %v63_v20 = vpack.c.bf16 %v36_v18, %v35_v17  ;;  %v39_v23 = vld [vmem:[%s1613_s0 + $0x60] sm:$0xff]  ;;  %v40_v24 = vld [vmem:[%s1613_s0 + $0x68] sm:$0xff]  ;;  %v64_v25 = vpack.c.bf16 %v38_v22, %v37_v21  ;;  %v41_v27 = vld [vmem:[%s1613_s0 + $0x70] sm:$0xff] }
   0x8   :  { %1041 = vmatprep.subr.bf16.mxu0 %v1155_v2  ;;  %v65_v26 = vpack.c.bf16 %v40_v24, %v39_v23  ;;  %v42_v28 = vld [vmem:[%s1613_s0 + $0x78] sm:$0xff]  ;;  %v43_v29 = vld [vmem:[%s1613_s0 + $0x80] sm:$0xff]  ;;  %v44_v30 = vld [vmem:[%s1613_s0 + $0x88] sm:$0xff] }
   0x9   :  { %v66_v31 = vpack.c.bf16 %v42_v28, %v41_v27  ;;  %v67_v32 = vpack.c.bf16 %v44_v30, %v43_v29  ;;  %v45_v33 = vld [vmem:[%s1613_s0 + $0x90] sm:$0xff]  ;;  %v46_v34 = vld [vmem:[%s1613_s0 + $0x98] sm:$0xff]  ;;  %v47_v35 = vld [vmem:[%s1613_s0 + $0xa0] sm:$0xff] }
   0xa   :  { %1152 = vmatpush3.bf16.msra.mxu1 %v1158_v14  ;;  %v48_v36 = vld [vmem:[%s1613_s0 + $0xa8] sm:$0xff]  ;;  %v68_v37 = vpack.c.bf16 %v46_v34, %v45_v33  ;;  %v49_v39 = vld [vmem:[%s1613_s0 + $0xb0] sm:$0xff]  ;;  %v50_v40 = vld [vmem:[%s1613_s0 + $0xb8] sm:$0xff] }
   0xb   :  { %1042 = vmatpush3.bf16.msra.mxu0 %v1155_v2  ;;  %v69_v38 = vpack.c.bf16 %v48_v36, %v47_v35  ;;  %v51_v41 = vld [vmem:[%s1613_s0 + $0xc0] sm:$0xff]  ;;  %v52_v42 = vld [vmem:[%s1613_s0 + $0xc8] sm:$0xff]  ;;  %v70_v43 = vpack.c.bf16 %v50_v40, %v49_v39  ;;  %v53_v45 = vld [vmem:[%s1613_s0 + $0xd0] sm:$0xff] }
   0xc   :  { %1043 = vmatprep.subr.bf16.mxu0 %v1156_v6  ;;  %v71_v44 = vpack.c.bf16 %v52_v42, %v51_v41  ;;  %v54_v46 = vld [vmem:[%s1613_s0 + $0xd8] sm:$0xff]  ;;  %v55_v47 = vld [vmem:[%s1613_s0 + $0xe0] sm:$0xff]  ;;  %v56_v48 = vld [vmem:[%s1613_s0 + $0xe8] sm:$0xff] }
   0xd   :  { %v72_v49 = vpack.c.bf16 %v54_v46, %v53_v45  ;;  %v73_v50 = vpack.c.bf16 %v56_v48, %v55_v47  ;;  %v57_v51 = vld [vmem:[%s1613_s0 + $0xf0] sm:$0xff]  ;;  %v58_v52 = vld [vmem:[%s1613_s0 + $0xf8] sm:$0xff]  ;;  %v1334_v54 = vld [vmem:[%s1615_s5] sm:$0xff]  }
   0xe   :  { %v74_v53 = vpack.c.bf16 %v58_v52, %v57_v51  ;;  %1113 = vmatprep.subr.bf16.mxu1 %v1334_v54  ;;  %v1340_v55 = vld [vmem:[%s1616_s2] ss:$0 sm:$0xff]  ;;  %v1160_v51 = vld [vmem:[%s1615_s5 + $0x8] sm:$0xff]  }
   0xf   :  { %1044 = vmatpush3.bf16.msra.mxu0 %v1156_v6 }
  0x10   :  { %1077 = vmatprep.subr.bf16.mxu0 %v1157_v13 }
  0x12   :  { %1046 = vmatmul.mubr.msk.bf16.vlgmr.msra.gmra.mrb[0].mxu0 %vm114_vm0, %v60_v11 }
  0x13   :  { %1049 = vmatprep.mubr.msk.bf16.mxu0 %vm114_vm0, %v61_v12  ;;  %1078 = vmatpush3.bf16.msra.mxu0 %v1157_v13 }
  0x14   :  { %1079 = vmatprep.subr.bf16.mxu0 %v1158_v14 }
  0x17   :  { %1080 = vmatpush3.bf16.msra.mxu0 %v1158_v14 }
  0x1a   :  { %1050 = vmatmul.mubr.msk.bf16.gmra.mrb[4].mxu0 %vm114_vm0, %v62_v19 }
  0x1b   :  { %1053 = vmatprep.mubr.msk.bf16.mxu0 %vm114_vm0, %v63_v20 }
  0x22   :  { %1054 = vmatmul.mubr.msk.bf16.gmra.mrb[8].mxu0 %vm114_vm0, %v64_v25 }
  0x23   :  { %1057 = vmatprep.mubr.msk.bf16.mxu0 %vm114_vm0, %v65_v26 }
  0x2a   :  { %1058 = vmatmul.mubr.msk.bf16.gmra.mrb[12].mxu0 %vm114_vm0, %v66_v31 }
  0x2b   :  { %1061 = vmatprep.mubr.msk.bf16.mxu0 %vm114_vm0, %v67_v32 }
  0x32   :  { %1062 = vmatmul.mubr.msk.bf16.gmra.mrb[16].mxu0 %vm114_vm0, %v68_v37 }
  0x33   :  { %1065 = vmatprep.mubr.msk.bf16.mxu0 %vm114_vm0, %v69_v38 }
  0x3a   :  { %1066 = vmatmul.mubr.msk.bf16.gmra.mrb[20].mxu0 %vm114_vm0, %v70_v43 }
  0x3b   :  { %1069 = vmatprep.mubr.msk.bf16.mxu0 %vm114_vm0, %v71_v44 }
  0x42   :  { %1070 = vmatmul.mubr.msk.bf16.gmra.mrb[24].mxu0 %vm114_vm0, %v72_v49 }
  0x43   :  { %1073 = vmatprep.mubr.msk.bf16.mxu0 %vm114_vm0, %v73_v50 }
  0x4a   :  { %1074 = vmatmul.mubr.msk.bf16.gmra.mrb[28].mxu0 %vm114_vm0, %v74_v53 }
  0xe5   :  { %v1047_v56 = vpop.f32.mrb[0].mxu0 }
  0xe6   :  { %v206_v57 = vadd.f32 %v1047_v56, %v1340_v55  ;;  %v197_v58 = vpop.f32.mrb[1].mxu0 }
  0xe7   :  { %v198_v59 = vadd.f32 %v1340_v55, %v197_v58  ;;  %v1048_v60 = vpop.f32.mrb[2].mxu0 }
  0xe8   :  { %v209_v61 = vadd.f32 %v1048_v60, %v1340_v55  ;;  %v200_v62 = vpop.f32.mrb[3].mxu0  ;;  %v326_v0 = vmax.f32 %v206_v57, 0.0 }
  0xe9   :  { %v201_v63 = vadd.f32 %v1340_v55, %v200_v62  ;;  %v324_v2 = vmax.f32 %v198_v59, 0.0 }
  0xea   :  { %v327_v1 = vmax.f32 %v209_v61, 0.0 }
  0xeb   :  { %v325_v3 = vmax.f32 %v201_v63, 0.0 }
  0xec   :  { %v357_v4 = vpack.c.bf16 %v327_v1, %v326_v0 }
  0xed   :  { %v356_v5 = vpack.c.bf16 %v325_v3, %v324_v2  ;;  %v1051_v6 = vpop.f32.mrb[4].mxu0 }
  0xee   :  { %v222_v7 = vadd.f32 %v1051_v6, %v1340_v55  ;;  %v213_v8 = vpop.f32.mrb[5].mxu0 }
  0xef   :  { %v214_v9 = vadd.f32 %v1340_v55, %v213_v8  ;;  %v1052_v10 = vpop.f32.mrb[6].mxu0  ;;  %1081 = vmatprep.mubr.msk.bf16.mxu0 %vm395_vm1, %v356_v5 }
  0xf0   :  { %v225_v11 = vadd.f32 %v1052_v10, %v1340_v55  ;;  %v216_v12 = vpop.f32.mrb[7].mxu0  ;;  %1082 = vmatmul.mubr.msk.bf16.vlgmr.msra.gmra.mrb[32].mxu0 %vm395_vm1, %v357_v4  ;;  %v330_v14 = vmax.f32 %v222_v7, 0.0 }
  0xf1   :  { %v217_v13 = vadd.f32 %v1340_v55, %v216_v12  ;;  %v328_v16 = vmax.f32 %v214_v9, 0.0 }
  0xf2   :  { %v331_v15 = vmax.f32 %v225_v11, 0.0 }
  0xf3   :  { %v329_v17 = vmax.f32 %v217_v13, 0.0 }
  0xf4   :  { %v359_v18 = vpack.c.bf16 %v331_v15, %v330_v14 }
  0xf5   :  { %v358_v19 = vpack.c.bf16 %v329_v17, %v328_v16  ;;  %v1055_v20 = vpop.f32.mrb[8].mxu0 }
  0xf6   :  { %v238_v21 = vadd.f32 %v1055_v20, %v1340_v55  ;;  %v229_v22 = vpop.f32.mrb[9].mxu0 }
  0xf7   :  { %v230_v23 = vadd.f32 %v1340_v55, %v229_v22  ;;  %v1056_v24 = vpop.f32.mrb[10].mxu0  ;;  %1085 = vmatprep.mubr.msk.bf16.mxu0 %vm395_vm1, %v358_v19 }
  0xf8   :  { %v241_v25 = vadd.f32 %v1056_v24, %v1340_v55  ;;  %v232_v26 = vpop.f32.mrb[11].mxu0  ;;  %1086 = vmatmul.mubr.msk.bf16.gmra.mrb[36].mxu0 %vm395_vm1, %v359_v18  ;;  %v334_v28 = vmax.f32 %v238_v21, 0.0 }
  0xf9   :  { %v233_v27 = vadd.f32 %v1340_v55, %v232_v26  ;;  %v332_v30 = vmax.f32 %v230_v23, 0.0 }
  0xfa   :  { %v335_v29 = vmax.f32 %v241_v25, 0.0 }
  0xfb   :  { %v333_v31 = vmax.f32 %v233_v27, 0.0 }
  0xfc   :  { %v361_v32 = vpack.c.bf16 %v335_v29, %v334_v28 }
  0xfd   :  { %v360_v33 = vpack.c.bf16 %v333_v31, %v332_v30  ;;  %v1059_v34 = vpop.f32.mrb[12].mxu0 }
  0xfe   :  { %v254_v35 = vadd.f32 %v1059_v34, %v1340_v55  ;;  %v245_v36 = vpop.f32.mrb[13].mxu0 }
  0xff   :  { %v246_v37 = vadd.f32 %v1340_v55, %v245_v36  ;;  %v1060_v38 = vpop.f32.mrb[14].mxu0  ;;  %1089 = vmatprep.mubr.msk.bf16.mxu0 %vm395_vm1, %v360_v33 }
 0x100   :  { %v257_v39 = vadd.f32 %v1060_v38, %v1340_v55  ;;  %v248_v40 = vpop.f32.mrb[15].mxu0  ;;  %1090 = vmatmul.mubr.msk.bf16.gmra.mrb[40].mxu0 %vm395_vm1, %v361_v32  ;;  %v338_v42 = vmax.f32 %v254_v35, 0.0 }
 0x101   :  { %v249_v41 = vadd.f32 %v1340_v55, %v248_v40  ;;  %v336_v44 = vmax.f32 %v246_v37, 0.0 }
 0x102   :  { %v339_v43 = vmax.f32 %v257_v39, 0.0 }
 0x103   :  { %v337_v45 = vmax.f32 %v249_v41, 0.0 }
 0x104   :  { %v363_v46 = vpack.c.bf16 %v339_v43, %v338_v42  ;;  %v1397_v42 = vld [vmem:[%s1617_s4] ss:$0 sm:$0xff] }
 0x105   :  { %v1063_v47 = vpop.f32.mrb[16].mxu0  ;;  %v362_v48 = vpack.c.bf16 %v337_v45, %v336_v44 }
 0x106   :  { %v270_v49 = vadd.f32 %v1063_v47, %v1340_v55  ;;  %v261_v50 = vpop.f32.mrb[17].mxu0 }
 0x107   :  { %v262_v52 = vadd.f32 %v1340_v55, %v261_v50  ;;  %v1064_v53 = vpop.f32.mrb[18].mxu0  ;;  %1093 = vmatprep.mubr.msk.bf16.mxu1 %vm395_vm1, %v362_v48 }
 0x108   :  { %v273_v56 = vadd.f32 %v1064_v53, %v1340_v55  ;;  %v264_v57 = vpop.f32.mrb[19].mxu0  ;;  %1094 = vmatmul.mubr.msk.bf16.vlgmr.msra.gmra.mrb[0].mxu1 %vm395_vm1, %v363_v46  ;;  %v342_v59 = vmax.f32 %v270_v49, 0.0 }
 0x109   :  { %v265_v58 = vadd.f32 %v1340_v55, %v264_v57  ;;  %1114 = vmatpush3.bf16.msra.mxu1 %v1334_v54  ;;  %v340_v61 = vmax.f32 %v262_v52, 0.0 }
 0x10a   :  { %v343_v60 = vmax.f32 %v273_v56, 0.0  ;;  %1115 = vmatprep.subr.bf16.mxu1 %v1160_v51 }
 0x10b   :  { %v341_v62 = vmax.f32 %v265_v58, 0.0 }
 0x10c   :  { %v365_v63 = vpack.c.bf16 %v343_v60, %v342_v59 }
 0x10d   :  { %v364_v0 = vpack.c.bf16 %v341_v62, %v340_v61  ;;  %v1067_v1 = vpop.f32.mrb[20].mxu0  ;;  %1116 = vmatpush3.bf16.msra.mxu1 %v1160_v51 }
 0x10e   :  { %v286_v2 = vadd.f32 %v1067_v1, %v1340_v55  ;;  %v277_v3 = vpop.f32.mrb[21].mxu0 }
 0x10f   :  { %v278_v4 = vadd.f32 %v1340_v55, %v277_v3  ;;  %v1068_v5 = vpop.f32.mrb[22].mxu0  ;;  %1097 = vmatprep.mubr.msk.bf16.mxu1 %vm395_vm1, %v364_v0 }
 0x110   :  { %v289_v6 = vadd.f32 %v1068_v5, %v1340_v55  ;;  %v280_v54 = vpop.f32.mrb[23].mxu0  ;;  %1098 = vmatmul.mubr.msk.bf16.gmra.mrb[4].mxu1 %vm395_vm1, %v365_v63  ;;  %v346_v8 = vmax.f32 %v286_v2, 0.0 }
 0x111   :  { %v281_v7 = vadd.f32 %v1340_v55, %v280_v54  ;;  %v344_v10 = vmax.f32 %v278_v4, 0.0 }
 0x112   :  { %v347_v9 = vmax.f32 %v289_v6, 0.0 }
 0x113   :  { %v345_v11 = vmax.f32 %v281_v7, 0.0 }
 0x114   :  { %v367_v12 = vpack.c.bf16 %v347_v9, %v346_v8 }
 0x115   :  { %v366_v13 = vpack.c.bf16 %v345_v11, %v344_v10  ;;  %v1071_v14 = vpop.f32.mrb[24].mxu0 }
 0x116   :  { %v302_v15 = vadd.f32 %v1071_v14, %v1340_v55  ;;  %v293_v16 = vpop.f32.mrb[25].mxu0 }
 0x117   :  { %v294_v17 = vadd.f32 %v1340_v55, %v293_v16  ;;  %v1072_v18 = vpop.f32.mrb[26].mxu0  ;;  %1101 = vmatprep.mubr.msk.bf16.mxu1 %vm395_vm1, %v366_v13 }
 0x118   :  { %v305_v19 = vadd.f32 %v1072_v18, %v1340_v55  ;;  %v296_v20 = vpop.f32.mrb[27].mxu0  ;;  %1102 = vmatmul.mubr.msk.bf16.gmra.mrb[8].mxu1 %vm395_vm1, %v367_v12  ;;  %v350_v22 = vmax.f32 %v302_v15, 0.0 }
 0x119   :  { %v297_v21 = vadd.f32 %v1340_v55, %v296_v20  ;;  %v348_v24 = vmax.f32 %v294_v17, 0.0 }
 0x11a   :  { %v351_v23 = vmax.f32 %v305_v19, 0.0 }
 0x11b   :  { %v349_v25 = vmax.f32 %v297_v21, 0.0 }
 0x11c   :  { %v369_v26 = vpack.c.bf16 %v351_v23, %v350_v22 }
 0x11d   :  { %v368_v27 = vpack.c.bf16 %v349_v25, %v348_v24  ;;  %v1075_v28 = vpop.f32.mrb[28].mxu0 }
 0x11e   :  { %v318_v29 = vadd.f32 %v1075_v28, %v1340_v55  ;;  %v309_v30 = vpop.f32.mrb[29].mxu0 }
 0x11f   :  { %v310_v31 = vadd.f32 %v1340_v55, %v309_v30  ;;  %v1076_v32 = vpop.f32.mrb[30].mxu0  ;;  %1105 = vmatprep.mubr.msk.bf16.mxu1 %vm395_vm1, %v368_v27 }
 0x120   :  { %v321_v33 = vadd.f32 %v1076_v32, %v1340_v55  ;;  %v312_v34 = vpop.f32.mrb[31].mxu0  ;;  %1106 = vmatmul.mubr.msk.bf16.gmra.mrb[12].mxu1 %vm395_vm1, %v369_v26  ;;  %v354_v36 = vmax.f32 %v318_v29, 0.0 }
 0x121   :  { %v313_v35 = vadd.f32 %v1340_v55, %v312_v34  ;;  %v352_v38 = vmax.f32 %v310_v31, 0.0 }
 0x122   :  { %v355_v37 = vmax.f32 %v321_v33, 0.0 }
 0x123   :  { %v353_v39 = vmax.f32 %v313_v35, 0.0 }
 0x124   :  { %v371_v40 = vpack.c.bf16 %v355_v37, %v354_v36 }
 0x125   :  { %v370_v41 = vpack.c.bf16 %v353_v39, %v352_v38 }
 0x127   :  { %1109 = vmatprep.mubr.msk.bf16.mxu1 %vm395_vm1, %v370_v41 }
 0x128   :  { %1110 = vmatmul.mubr.msk.bf16.gmra.mrb[16].mxu1 %vm395_vm1, %v371_v40 }
 0x1c3   :  { %v1083_v43 = vpop.f32.mrb[32].mxu0 }
 0x1c4   :  { %v487_v44 = vadd.f32 %v1083_v43, %v1397_v42  ;;  %v478_v45 = vpop.f32.mrb[33].mxu0 }
 0x1c5   :  { %v479_v55 = vadd.f32 %v1397_v42, %v478_v45  ;;  %v1084_v46 = vpop.f32.mrb[34].mxu0 }
 0x1c6   :  { %v490_v47 = vadd.f32 %v1084_v46, %v1397_v42  ;;  %v481_v48 = vpop.f32.mrb[35].mxu0  ;;  %v607_v50 = vmax.f32 %v487_v44, 0.0 }
 0x1c7   :  { %v482_v49 = vadd.f32 %v1397_v42, %v481_v48  ;;  %v605_v52 = vmax.f32 %v479_v55, 0.0 }
 0x1c8   :  { %v608_v51 = vmax.f32 %v490_v47, 0.0 }
 0x1c9   :  { %v606_v53 = vmax.f32 %v482_v49, 0.0 }
 0x1ca   :  { %v638_v56 = vpack.c.bf16 %v608_v51, %v607_v50 }
 0x1cb   :  { %v637_v57 = vpack.c.bf16 %v606_v53, %v605_v52  ;;  %v1087_v58 = vpop.f32.mrb[36].mxu0 }
 0x1cc   :  { %v503_v59 = vadd.f32 %v1087_v58, %v1397_v42  ;;  %v494_v60 = vpop.f32.mrb[37].mxu0 }
 0x1cd   :  { %v495_v61 = vadd.f32 %v1397_v42, %v494_v60  ;;  %v1088_v62 = vpop.f32.mrb[38].mxu0  ;;  %1117 = vmatprep.mubr.msk.bf16.mxu1 %vm395_vm1, %v637_v57 }
 0x1ce   :  { %v506_v63 = vadd.f32 %v1088_v62, %v1397_v42  ;;  %v497_v0 = vpop.f32.mrb[39].mxu0  ;;  %1118 = vmatmul.mubr.msk.bf16.vlgmr.msra.gmra.mrb[20].mxu1 %vm395_vm1, %v638_v56  ;;  %v611_v2 = vmax.f32 %v503_v59, 0.0 }
 0x1cf   :  { %v498_v1 = vadd.f32 %v1397_v42, %v497_v0  ;;  %v609_v4 = vmax.f32 %v495_v61, 0.0 }
 0x1d0   :  { %v612_v3 = vmax.f32 %v506_v63, 0.0 }
 0x1d1   :  { %v610_v5 = vmax.f32 %v498_v1, 0.0 }
 0x1d2   :  { %v640_v6 = vpack.c.bf16 %v612_v3, %v611_v2 }
 0x1d3   :  { %v639_v54 = vpack.c.bf16 %v610_v5, %v609_v4  ;;  %v1091_v7 = vpop.f32.mrb[40].mxu0 }
 0x1d4   :  { %v519_v8 = vadd.f32 %v1091_v7, %v1397_v42  ;;  %v510_v9 = vpop.f32.mrb[41].mxu0 }
 0x1d5   :  { %v511_v10 = vadd.f32 %v1397_v42, %v510_v9  ;;  %v1092_v11 = vpop.f32.mrb[42].mxu0  ;;  %1121 = vmatprep.mubr.msk.bf16.mxu1 %vm395_vm1, %v639_v54 }
 0x1d6   :  { %v522_v12 = vadd.f32 %v1092_v11, %v1397_v42  ;;  %v513_v13 = vpop.f32.mrb[43].mxu0  ;;  %1122 = vmatmul.mubr.msk.bf16.gmra.mrb[24].mxu1 %vm395_vm1, %v640_v6  ;;  %v615_v15 = vmax.f32 %v519_v8, 0.0 }
 0x1d7   :  { %v514_v14 = vadd.f32 %v1397_v42, %v513_v13  ;;  %v613_v17 = vmax.f32 %v511_v10, 0.0 }
 0x1d8   :  { %v616_v16 = vmax.f32 %v522_v12, 0.0 }
 0x1d9   :  { %v614_v18 = vmax.f32 %v514_v14, 0.0 }
 0x1da   :  { %v642_v19 = vpack.c.bf16 %v616_v16, %v615_v15 }
 0x1db   :  { %v641_v20 = vpack.c.bf16 %v614_v18, %v613_v17  ;;  %v1095_v21 = vpop.f32.mrb[0].mxu1 }
 0x1dc   :  { %v535_v22 = vadd.f32 %v1095_v21, %v1397_v42  ;;  %v526_v23 = vpop.f32.mrb[1].mxu1 }
 0x1dd   :  { %v527_v24 = vadd.f32 %v1397_v42, %v526_v23  ;;  %v1096_v25 = vpop.f32.mrb[2].mxu1  ;;  %1125 = vmatprep.mubr.msk.bf16.mxu1 %vm395_vm1, %v641_v20 }
 0x1de   :  { %v538_v26 = vadd.f32 %v1096_v25, %v1397_v42  ;;  %v529_v27 = vpop.f32.mrb[3].mxu1  ;;  %1126 = vmatmul.mubr.msk.bf16.gmra.mrb[28].mxu1 %vm395_vm1, %v642_v19  ;;  %v619_v29 = vmax.f32 %v535_v22, 0.0 }
 0x1df   :  { %v530_v28 = vadd.f32 %v1397_v42, %v529_v27  ;;  %v617_v31 = vmax.f32 %v527_v24, 0.0 }
 0x1e0   :  { %v620_v30 = vmax.f32 %v538_v26, 0.0 }
 0x1e1   :  { %v618_v32 = vmax.f32 %v530_v28, 0.0  ;;  %v1450_v28 = vld [vmem:[%s1618_s6] ss:$0 sm:$0xff] }
 0x1e2   :  { %v644_v33 = vpack.c.bf16 %v620_v30, %v619_v29 }
 0x1e3   :  { %v643_v34 = vpack.c.bf16 %v618_v32, %v617_v31  ;;  %v1099_v35 = vpop.f32.mrb[4].mxu1 }
 0x1e4   :  { %v551_v36 = vadd.f32 %v1099_v35, %v1397_v42  ;;  %v542_v37 = vpop.f32.mrb[5].mxu1 }
 0x1e5   :  { %v543_v38 = vadd.f32 %v1397_v42, %v542_v37  ;;  %v1100_v39 = vpop.f32.mrb[6].mxu1  ;;  %1129 = vmatprep.mubr.msk.bf16.mxu1 %vm395_vm1, %v643_v34 }
 0x1e6   :  { %v554_v40 = vadd.f32 %v1100_v39, %v1397_v42  ;;  %v545_v41 = vpop.f32.mrb[7].mxu1  ;;  %1130 = vmatmul.mubr.msk.bf16.gmra.mrb[32].mxu1 %vm395_vm1, %v644_v33  ;;  %v623_v44 = vmax.f32 %v551_v36, 0.0 }
 0x1e7   :  { %v546_v43 = vadd.f32 %v1397_v42, %v545_v41  ;;  %v621_v55 = vmax.f32 %v543_v38, 0.0 }
 0x1e8   :  { %v624_v45 = vmax.f32 %v554_v40, 0.0 }
 0x1e9   :  { %v622_v46 = vmax.f32 %v546_v43, 0.0 }
 0x1ea   :  { %v646_v47 = vpack.c.bf16 %v624_v45, %v623_v44 }
 0x1eb   :  { %v645_v48 = vpack.c.bf16 %v622_v46, %v621_v55  ;;  %v1103_v49 = vpop.f32.mrb[8].mxu1 }
 0x1ec   :  { %v567_v50 = vadd.f32 %v1103_v49, %v1397_v42  ;;  %v558_v51 = vpop.f32.mrb[9].mxu1 }
 0x1ed   :  { %v559_v52 = vadd.f32 %v1397_v42, %v558_v51  ;;  %v1104_v53 = vpop.f32.mrb[10].mxu1  ;;  %1133 = vmatprep.mubr.msk.bf16.mxu1 %vm395_vm1, %v645_v48 }
 0x1ee   :  { %v570_v56 = vadd.f32 %v1104_v53, %v1397_v42  ;;  %v561_v57 = vpop.f32.mrb[11].mxu1  ;;  %1134 = vmatmul.mubr.msk.bf16.gmra.mrb[36].mxu1 %vm395_vm1, %v646_v47  ;;  %v627_v59 = vmax.f32 %v567_v50, 0.0 }
 0x1ef   :  { %v562_v58 = vadd.f32 %v1397_v42, %v561_v57  ;;  %v625_v61 = vmax.f32 %v559_v52, 0.0 }
 0x1f0   :  { %v628_v60 = vmax.f32 %v570_v56, 0.0 }
 0x1f1   :  { %v626_v62 = vmax.f32 %v562_v58, 0.0 }
 0x1f2   :  { %v648_v63 = vpack.c.bf16 %v628_v60, %v627_v59 }
 0x1f3   :  { %v647_v0 = vpack.c.bf16 %v626_v62, %v625_v61  ;;  %v1107_v1 = vpop.f32.mrb[12].mxu1 }
 0x1f4   :  { %v583_v2 = vadd.f32 %v1107_v1, %v1397_v42  ;;  %v574_v3 = vpop.f32.mrb[13].mxu1 }
 0x1f5   :  { %v575_v4 = vadd.f32 %v1397_v42, %v574_v3  ;;  %v1108_v5 = vpop.f32.mrb[14].mxu1  ;;  %1137 = vmatprep.mubr.msk.bf16.mxu1 %vm395_vm1, %v647_v0 }
 0x1f6   :  { %v586_v6 = vadd.f32 %v1108_v5, %v1397_v42  ;;  %v577_v54 = vpop.f32.mrb[15].mxu1  ;;  %1138 = vmatmul.mubr.msk.bf16.gmra.mrb[40].mxu1 %vm395_vm1, %v648_v63  ;;  %v631_v8 = vmax.f32 %v583_v2, 0.0 }
 0x1f7   :  { %v578_v7 = vadd.f32 %v1397_v42, %v577_v54  ;;  %v629_v10 = vmax.f32 %v575_v4, 0.0 }
 0x1f8   :  { %v632_v9 = vmax.f32 %v586_v6, 0.0 }
 0x1f9   :  { %v630_v11 = vmax.f32 %v578_v7, 0.0 }
 0x1fa   :  { %v650_v12 = vpack.c.bf16 %v632_v9, %v631_v8 }
 0x1fb   :  { %v649_v13 = vpack.c.bf16 %v630_v11, %v629_v10  ;;  %v1111_v14 = vpop.f32.mrb[16].mxu1 }
 0x1fc   :  { %v599_v15 = vadd.f32 %v1111_v14, %v1397_v42  ;;  %v590_v16 = vpop.f32.mrb[17].mxu1 }
 0x1fd   :  { %v591_v17 = vadd.f32 %v1397_v42, %v590_v16  ;;  %v1112_v18 = vpop.f32.mrb[18].mxu1  ;;  %1141 = vmatprep.mubr.msk.bf16.mxu1 %vm395_vm1, %v649_v13 }
 0x1fe   :  { %v602_v19 = vadd.f32 %v1112_v18, %v1397_v42  ;;  %v593_v20 = vpop.f32.mrb[19].mxu1  ;;  %1142 = vmatmul.mubr.msk.bf16.gmra.mrb[44].mxu1 %vm395_vm1, %v650_v12  ;;  %v635_v22 = vmax.f32 %v599_v15, 0.0 }
 0x1ff   :  { %v594_v21 = vadd.f32 %v1397_v42, %v593_v20  ;;  %v633_v24 = vmax.f32 %v591_v17, 0.0 }
 0x200   :  { %v636_v23 = vmax.f32 %v602_v19, 0.0 }
 0x201   :  { %v634_v25 = vmax.f32 %v594_v21, 0.0 }
 0x202   :  { %v652_v26 = vpack.c.bf16 %v636_v23, %v635_v22 }
 0x203   :  { %v651_v27 = vpack.c.bf16 %v634_v25, %v633_v24 }
 0x205   :  { %1145 = vmatprep.mubr.msk.bf16.mxu1 %vm395_vm1, %v651_v27 }
 0x206   :  { %1146 = vmatmul.mubr.msk.bf16.gmra.mrb[48].mxu1 %vm395_vm1, %v652_v26 }
 0x2a1   :  { %v1119_v29 = vpop.f32.mrb[20].mxu1 }
 0x2a2   :  { %v767_v30 = vadd.f32 %v1119_v29, %v1450_v28  ;;  %v758_v42 = vpop.f32.mrb[21].mxu1 }
 0x2a3   :  { %v759_v31 = vadd.f32 %v1450_v28, %v758_v42  ;;  %v1120_v32 = vpop.f32.mrb[22].mxu1 }
 0x2a4   :  { %888 = vst.msk [vmem:[%s1619_s7 + $0x10] sm:$0xff] %vm885_vm2, %v767_v30  ;;  %v770_v33 = vadd.f32 %v1120_v32, %v1450_v28  ;;  %v761_v34 = vpop.f32.mrb[23].mxu1 }
 0x2a5   :  { %886 = vst.msk [vmem:[%s1619_s7] sm:$0xff] %vm885_vm2, %v759_v31  ;;  %v762_v35 = vadd.f32 %v1450_v28, %v761_v34 }
 0x2a6   :  { %889 = vst.msk [vmem:[%s1619_s7 + $0x18] sm:$0xff] %vm885_vm2, %v770_v33 }
 0x2a7   :  { %887 = vst.msk [vmem:[%s1619_s7 + $0x8] sm:$0xff] %vm885_vm2, %v762_v35 }
 0x2a9   :  { %v1123_v36 = vpop.f32.mrb[24].mxu1 }
 0x2aa   :  { %v783_v37 = vadd.f32 %v1123_v36, %v1450_v28  ;;  %v774_v38 = vpop.f32.mrb[25].mxu1 }
 0x2ab   :  { %v775_v39 = vadd.f32 %v1450_v28, %v774_v38  ;;  %v1124_v40 = vpop.f32.mrb[26].mxu1 }
 0x2ac   :  { %892 = vst.msk [vmem:[%s1619_s7 + $0x30] sm:$0xff] %vm885_vm2, %v783_v37  ;;  %v786_v41 = vadd.f32 %v1124_v40, %v1450_v28  ;;  %v777_v43 = vpop.f32.mrb[27].mxu1 }
 0x2ad   :  { %890 = vst.msk [vmem:[%s1619_s7 + $0x20] sm:$0xff] %vm885_vm2, %v775_v39  ;;  %v778_v44 = vadd.f32 %v1450_v28, %v777_v43 }
 0x2ae   :  { %893 = vst.msk [vmem:[%s1619_s7 + $0x38] sm:$0xff] %vm885_vm2, %v786_v41 }
 0x2af   :  { %891 = vst.msk [vmem:[%s1619_s7 + $0x28] sm:$0xff] %vm885_vm2, %v778_v44 }
 0x2b1   :  { %v1127_v45 = vpop.f32.mrb[28].mxu1 }
 0x2b2   :  { %v799_v55 = vadd.f32 %v1127_v45, %v1450_v28  ;;  %v790_v46 = vpop.f32.mrb[29].mxu1 }
 0x2b3   :  { %v791_v47 = vadd.f32 %v1450_v28, %v790_v46  ;;  %v1128_v48 = vpop.f32.mrb[30].mxu1 }
 0x2b4   :  { %896 = vst.msk [vmem:[%s1619_s7 + $0x50] sm:$0xff] %vm885_vm2, %v799_v55  ;;  %v802_v49 = vadd.f32 %v1128_v48, %v1450_v28  ;;  %v793_v50 = vpop.f32.mrb[31].mxu1 }
 0x2b5   :  { %894 = vst.msk [vmem:[%s1619_s7 + $0x40] sm:$0xff] %vm885_vm2, %v791_v47  ;;  %v794_v51 = vadd.f32 %v1450_v28, %v793_v50 }
 0x2b6   :  { %897 = vst.msk [vmem:[%s1619_s7 + $0x58] sm:$0xff] %vm885_vm2, %v802_v49 }
 0x2b7   :  { %895 = vst.msk [vmem:[%s1619_s7 + $0x48] sm:$0xff] %vm885_vm2, %v794_v51 }
 0x2b9   :  { %v1131_v52 = vpop.f32.mrb[32].mxu1 }
 0x2ba   :  { %v815_v53 = vadd.f32 %v1131_v52, %v1450_v28  ;;  %v806_v56 = vpop.f32.mrb[33].mxu1 }
 0x2bb   :  { %v807_v57 = vadd.f32 %v1450_v28, %v806_v56  ;;  %v1132_v58 = vpop.f32.mrb[34].mxu1 }
 0x2bc   :  { %900 = vst.msk [vmem:[%s1619_s7 + $0x70] sm:$0xff] %vm885_vm2, %v815_v53  ;;  %v818_v59 = vadd.f32 %v1132_v58, %v1450_v28  ;;  %v809_v60 = vpop.f32.mrb[35].mxu1 }
 0x2bd   :  { %898 = vst.msk [vmem:[%s1619_s7 + $0x60] sm:$0xff] %vm885_vm2, %v807_v57  ;;  %v810_v61 = vadd.f32 %v1450_v28, %v809_v60 }
 0x2be   :  { %901 = vst.msk [vmem:[%s1619_s7 + $0x78] sm:$0xff] %vm885_vm2, %v818_v59 }
 0x2bf   :  { %899 = vst.msk [vmem:[%s1619_s7 + $0x68] sm:$0xff] %vm885_vm2, %v810_v61 }
 0x2c1   :  { %v1135_v62 = vpop.f32.mrb[36].mxu1 }
 0x2c2   :  { %v831_v63 = vadd.f32 %v1135_v62, %v1450_v28  ;;  %v822_v0 = vpop.f32.mrb[37].mxu1 }
 0x2c3   :  { %v823_v1 = vadd.f32 %v1450_v28, %v822_v0  ;;  %v1136_v2 = vpop.f32.mrb[38].mxu1 }
 0x2c4   :  { %904 = vst.msk [vmem:[%s1619_s7 + $0x90] sm:$0xff] %vm885_vm2, %v831_v63  ;;  %v834_v3 = vadd.f32 %v1136_v2, %v1450_v28  ;;  %v825_v4 = vpop.f32.mrb[39].mxu1 }
 0x2c5   :  { %902 = vst.msk [vmem:[%s1619_s7 + $0x80] sm:$0xff] %vm885_vm2, %v823_v1  ;;  %v826_v5 = vadd.f32 %v1450_v28, %v825_v4 }
 0x2c6   :  { %905 = vst.msk [vmem:[%s1619_s7 + $0x98] sm:$0xff] %vm885_vm2, %v834_v3 }
 0x2c7   :  { %903 = vst.msk [vmem:[%s1619_s7 + $0x88] sm:$0xff] %vm885_vm2, %v826_v5 }
 0x2c9   :  { %v1139_v6 = vpop.f32.mrb[40].mxu1 }
 0x2ca   :  { %v847_v54 = vadd.f32 %v1139_v6, %v1450_v28  ;;  %v838_v7 = vpop.f32.mrb[41].mxu1 }
 0x2cb   :  { %v839_v8 = vadd.f32 %v1450_v28, %v838_v7  ;;  %v1140_v9 = vpop.f32.mrb[42].mxu1 }
 0x2cc   :  { %908 = vst.msk [vmem:[%s1619_s7 + $0xb0] sm:$0xff] %vm885_vm2, %v847_v54  ;;  %v850_v10 = vadd.f32 %v1140_v9, %v1450_v28  ;;  %v841_v11 = vpop.f32.mrb[43].mxu1 }
 0x2cd   :  { %906 = vst.msk [vmem:[%s1619_s7 + $0xa0] sm:$0xff] %vm885_vm2, %v839_v8  ;;  %v842_v12 = vadd.f32 %v1450_v28, %v841_v11 }
 0x2ce   :  { %909 = vst.msk [vmem:[%s1619_s7 + $0xb8] sm:$0xff] %vm885_vm2, %v850_v10 }
 0x2cf   :  { %907 = vst.msk [vmem:[%s1619_s7 + $0xa8] sm:$0xff] %vm885_vm2, %v842_v12 }
 0x2d1   :  { %v1143_v13 = vpop.f32.mrb[44].mxu1 }
 0x2d2   :  { %v863_v14 = vadd.f32 %v1143_v13, %v1450_v28  ;;  %v854_v15 = vpop.f32.mrb[45].mxu1 }
 0x2d3   :  { %v855_v16 = vadd.f32 %v1450_v28, %v854_v15  ;;  %v1144_v17 = vpop.f32.mrb[46].mxu1 }
 0x2d4   :  { %912 = vst.msk [vmem:[%s1619_s7 + $0xd0] sm:$0xff] %vm885_vm2, %v863_v14  ;;  %v866_v18 = vadd.f32 %v1144_v17, %v1450_v28  ;;  %v857_v19 = vpop.f32.mrb[47].mxu1 }
 0x2d5   :  { %910 = vst.msk [vmem:[%s1619_s7 + $0xc0] sm:$0xff] %vm885_vm2, %v855_v16  ;;  %v858_v20 = vadd.f32 %v1450_v28, %v857_v19 }
 0x2d6   :  { %913 = vst.msk [vmem:[%s1619_s7 + $0xd8] sm:$0xff] %vm885_vm2, %v866_v18 }
 0x2d7   :  { %911 = vst.msk [vmem:[%s1619_s7 + $0xc8] sm:$0xff] %vm885_vm2, %v858_v20 }
 0x2d9   :  { %v1147_v21 = vpop.f32.mrb[48].mxu1 }
 0x2da   :  { %v879_v22 = vadd.f32 %v1147_v21, %v1450_v28  ;;  %v870_v23 = vpop.f32.mrb[49].mxu1 }
 0x2db   :  { %v871_v24 = vadd.f32 %v1450_v28, %v870_v23  ;;  %v1148_v25 = vpop.f32.mrb[50].mxu1 }
 0x2dc   :  { %916 = vst.msk [vmem:[%s1619_s7 + $0xf0] sm:$0xff] %vm885_vm2, %v879_v22  ;;  %v882_v26 = vadd.f32 %v1148_v25, %v1450_v28  ;;  %v873_v27 = vpop.f32.mrb[51].mxu1 }
 0x2dd   :  { %914 = vst.msk [vmem:[%s1619_s7 + $0xe0] sm:$0xff] %vm885_vm2, %v871_v24  ;;  %v874_v29 = vadd.f32 %v1450_v28, %v873_v27 }
 0x2de   :  { %917 = vst.msk [vmem:[%s1619_s7 + $0xf8] sm:$0xff] %vm885_vm2, %v882_v26 }
 0x2df   :  { %915 = vst.msk [vmem:[%s1619_s7 + $0xe8] sm:$0xff] %vm885_vm2, %v874_v29 }

</bundles_post_ra>
